<compile_context>
chip_gen: v7x
topology: tpu7x:2x2x1
jax: 0.10.0
libtpu: 0.0.40
codegen_flags: <defaults>
</compile_context>

<pallas_src>
import functools

import jax
import jax.numpy as jnp
from jax import lax
from jax.experimental import pallas as pl
from jax.experimental.pallas import tpu as pltpu


_VMEM_LIMIT_BYTES = 32 * 1024 * 1024       # scoped VMEM limit (safe on v5e/v6e/v7x)
_PIPELINE_BUF_BUDGET = 12 * 1024 * 1024    # bytes for pipeline buffers + f32 temps
_TARGET_GRID_STEPS = 8                     # >= 4 steps per TC on v7x megacore


def _round_up(n, m):
    return ((n + m - 1) // m) * m


def _sublane(dtype):
    itemsize = jnp.dtype(dtype).itemsize
    return {4: 8, 2: 16, 1: 32}.get(itemsize, 8)


def _choose_tile_rows(rows, c, dtype):
    sub = _sublane(dtype)
    itemsize = jnp.dtype(dtype).itemsize
    # Per-row VMEM footprint: 2 double-buffered input tiles + 2 output tiles
    # (4 * itemsize) plus ~2 f32 row-copies of in-kernel intermediates (8 B).
    per_row_bytes = c * (4 * itemsize + 8)
    max_rows = max(sub, _PIPELINE_BUF_BUDGET // per_row_bytes)
    tile_rows = max(sub, (max_rows // sub) * sub)
    # Keep enough grid steps for double-buffer overlap and 2-TC sharding on
    # v7x: aim for ~_TARGET_GRID_STEPS steps whenever rows allow.
    steps_cap = max(sub, _round_up(pl.cdiv(rows, _TARGET_GRID_STEPS), sub))
    tile_rows = min(tile_rows, steps_cap)
    # Never exceed the (sublane-rounded) row count.
    tile_rows = min(tile_rows, _round_up(rows, sub))
    return tile_rows


def _biasfree_ln_kernel(x_ref, w_ref, o_ref, *, inv_c):
    # x_ref: (TILE_ROWS, C), w_ref: (1, C), o_ref: (TILE_ROWS, C)
    x = x_ref[...]                           # native dtype (f32 or bf16)
    xf = x.astype(jnp.float32)

    # Two-pass biased variance over the (full) last dim, f32 accumulation.
    mu = jnp.sum(xf, axis=-1, keepdims=True) * inv_c
    d = xf - mu
    var = jnp.sum(d * d, axis=-1, keepdims=True) * inv_c

    # Bias-free: divide by sqrt(var + eps), do NOT subtract the mean.
    scale = lax.rsqrt(var + 1e-5)            # f32 (TILE_ROWS, 1), on the EUP

    # Elementwise scale in the input's native dtype: bf16 stays on the bf16
    # VPU on v6e/v7x; for f32 inputs this is exactly the f32 path.
    o_ref[...] = (x * scale.astype(x.dtype) * w_ref[...]).astype(o_ref.dtype)


@jax.jit
def biasfree_layernorm(x, weight):
    """x: (..., C), weight: (C,). Returns x / sqrt(var(x, -1) + 1e-5) * weight."""
    orig_shape = x.shape
    C = orig_shape[-1]
    rows = 1
    for d in orig_shape[:-1]:
        rows *= d

    x2 = x.reshape(rows, C)
    w2 = weight.reshape(1, C).astype(x.dtype)

    tile_rows = _choose_tile_rows(rows, C, x.dtype)
    grid = (pl.cdiv(rows, tile_rows),)

    kernel = functools.partial(_biasfree_ln_kernel, inv_c=1.0 / float(C))

    itemsize = jnp.dtype(x.dtype).itemsize
    cost = pl.CostEstimate(
        flops=5 * rows * C,
        transcendentals=rows,
        bytes_accessed=2 * rows * C * itemsize + C * itemsize,
    )

    out = pl.pallas_call(
        kernel,
        out_shape=jax.ShapeDtypeStruct((rows, C), x.dtype),
        grid_spec=pltpu.PrefetchScalarGridSpec(
            num_scalar_prefetch=0,
            grid=grid,
            in_specs=[
                # Last dim == full array extent C: legal even when C % 128 != 0
                # (Mosaic masks). No wrapper pad/slice, no extra HBM passes.
                pl.BlockSpec((tile_rows, C), lambda i: (i, 0)),
                pl.BlockSpec((1, C), lambda i: (0, 0)),
            ],
            out_specs=pl.BlockSpec((tile_rows, C), lambda i: (i, 0)),
        ),
        compiler_params=pltpu.CompilerParams(
            dimension_semantics=("parallel",),
            vmem_limit_bytes=_VMEM_LIMIT_BYTES,
        ),
        cost_estimate=cost,
    )(x2, w2)

    return out.reshape(orig_shape)


def _reference(x, weight):
    x32 = x.astype(jnp.float32)
    var = jnp.var(x32, axis=-1, keepdims=True)  # biased (ddof=0) == torch unbiased=False
    return (x32 / jnp.sqrt(var + 1e-5) * weight.astype(jnp.float32)).astype(x.dtype)


if __name__ == "__main__":
    key = jax.random.PRNGKey(0)
    # Shapes implied by the module: x (..., hidden), weight (hidden,)
    batch, seq, hidden = 2, 8, 32
    x = jax.random.normal(key, (batch, seq, hidden), dtype=jnp.float32)
    weight = jnp.ones((hidden,), dtype=jnp.float32)  # nn.Parameter(torch.ones(...))

    out = biasfree_layernorm(x, weight)
    out = jax.block_until_ready(out)

    ref = _reference(x, weight)
    assert out.shape == x.shape
    assert jnp.allclose(out, ref, atol=1e-5, rtol=1e-5), "mismatch vs reference"

    print("KERNEL_OK")
</pallas_src>

<mosaic_0001>
module attributes {stable_mosaic.version = 11 : i64} {
  func.func @_biasfree_ln_kernel(%arg0: i32, %arg1: memref<8x32xf32, #tpu.memory_space<vmem>>, %arg2: memref<1x32xf32, #tpu.memory_space<vmem>>, %arg3: memref<8x32xf32, #tpu.memory_space<vmem>>) attributes {dimension_semantics = [#tpu.dimension_semantics<parallel>], iteration_bounds = array<i64: 2>, scalar_prefetch = 0 : i64, scratch_operands = 0 : i64, tpu.core_type = #tpu.core_type<tc>, window_params = [{transform_indices = @transform_0, window_bounds = array<i64: 8, 32>}, {pipeline_mode = #tpu.pipeline_mode<synchronous>, transform_indices = @transform_1, window_bounds = array<i64: 1, 32>}, {transform_indices = @transform_2, window_bounds = array<i64: 8, 32>}]} {
    %c0 = arith.constant 0 : index
    %c0_0 = arith.constant 0 : index
    %0 = vector.load %arg1[%c0, %c0_0] : memref<8x32xf32, #tpu.memory_space<vmem>>, vector<8x32xf32>
    %cst = arith.constant dense<0.000000e+00> : vector<8xf32>
    %1 = vector.multi_reduction <add>, %0, %cst [1] : vector<8x32xf32> to vector<8xf32>
    %2 = vector.shape_cast %1 : vector<8xf32> to vector<8x1xf32>
    %cst_1 = arith.constant 3.125000e-02 : f32
    %3 = vector.broadcast %cst_1 : f32 to vector<8x1xf32>
    %4 = arith.mulf %2, %3 : vector<8x1xf32>
    %5 = vector.broadcast %4 : vector<8x1xf32> to vector<8x32xf32>
    %6 = arith.subf %0, %5 : vector<8x32xf32>
    %7 = arith.mulf %6, %6 : vector<8x32xf32>
    %cst_2 = arith.constant dense<0.000000e+00> : vector<8xf32>
    %8 = vector.multi_reduction <add>, %7, %cst_2 [1] : vector<8x32xf32> to vector<8xf32>
    %9 = vector.shape_cast %8 : vector<8xf32> to vector<8x1xf32>
    %cst_3 = arith.constant 3.125000e-02 : f32
    %10 = vector.broadcast %cst_3 : f32 to vector<8x1xf32>
    %11 = arith.mulf %9, %10 : vector<8x1xf32>
    %cst_4 = arith.constant 9.99999974E-6 : f32
    %12 = vector.broadcast %cst_4 : f32 to vector<8x1xf32>
    %13 = arith.addf %11, %12 : vector<8x1xf32>
    %14 = math.rsqrt %13 : vector<8x1xf32>
    %15 = vector.broadcast %14 : vector<8x1xf32> to vector<8x32xf32>
    %16 = arith.mulf %0, %15 : vector<8x32xf32>
    %c0_5 = arith.constant 0 : index
    %c0_6 = arith.constant 0 : index
    %17 = vector.load %arg2[%c0_5, %c0_6] : memref<1x32xf32, #tpu.memory_space<vmem>>, vector<1x32xf32>
    %18 = vector.broadcast %17 : vector<1x32xf32> to vector<8x32xf32>
    %19 = arith.mulf %16, %18 : vector<8x32xf32>
    %c0_7 = arith.constant 0 : index
    %c0_8 = arith.constant 0 : index
    %20 = vector.load %arg3[%c0_7, %c0_8] : memref<8x32xf32, #tpu.memory_space<vmem>>, vector<8x32xf32>
    tpu.vector_store %arg3[%c0_7, %c0_8], %19 {strides = array<i32>} : memref<8x32xf32, #tpu.memory_space<vmem>>, vector<8x32xf32>,
    return
  }
  func.func @transform_0(%arg0: i32) -> (i32, i32) {
    %c0_i32 = arith.constant 0 : i32
    %c0_i32_0 = arith.constant 0 : i32
    return %arg0, %c0_i32 : i32, i32
  }
  func.func @transform_1(%arg0: i32) -> (i32, i32) {
    %c0_i32 = arith.constant 0 : i32
    %c0_i32_0 = arith.constant 0 : i32
    %c0_i32_1 = arith.constant 0 : i32
    return %c0_i32, %c0_i32_0 : i32, i32
  }
  func.func @transform_2(%arg0: i32) -> (i32, i32) {
    %c0_i32 = arith.constant 0 : i32
    %c0_i32_0 = arith.constant 0 : i32
    return %arg0, %c0_i32 : i32, i32
  }
}

</mosaic_0001>

<bundles_post_ra>
// kernel: biasfree_layernorm.1
= control target key start
LH: loop header
LB: loop body
LE: loop exit
PB: predicated region body
PF: predicated region fallthrough
CT: control target
= control target key end

     0   :  { %7 = vsyncpa [#allocation3], 0  ;;  %s610_s0 = inlined_call_operand.hbm [shape: f32[16,32], index: 0, kind: input, shape index: {}]   ;;  %s611_s1 = inlined_call_operand.vmem [shape: f32[1,32], index: 1, kind: input, shape index: {}]   ;;  %s612_s2 = inlined_call_operand.hbm [shape: f32[16,32], index: 2, kind: output, shape index: {}]  }
   0x1   :  { %9 = vsyncpa [#allocation3 + $0x1], 0 }
   0x2   :  { %10 = vsyncpa [#allocation4], 0 }
   0x3   :  { %12 = vsyncpa [#allocation4 + $0x1], 0  ;;  %s443_s9 = smov 0   ;;  %s445_s10 = smov 0  }
   0x4   :  { %s447_s11 = smov 0   ;;  %s449_s12 = smov 0  }
   0x5 LB: > { %s464_s13 = sadd.s32 4294967295, %s424_s12   ;;  %s267_s14 = sadd.s32 4294967294, %s424_s12   ;;  %s424_s12 = sphi %s449_s12, %s627_s12   ;;  %s420_s11 = sphi %s447_s11, %s626_s11   ;;  %s416_s10 = sphi %s445_s10, %s625_s10   ;;  %s412_s9 = sphi %s443_s9, %s624_s9  }
   0x6   : > { %s468_s15 = sadd.s32 1, %s424_s12   ;;  %s25_s16 = sadd.s32 1, %s420_s11 }
   0x7   : > { %s22_s17 = ssub.s32 %s424_s12, %s468_s15  ;;  %p32_p0 = scmp.ne.s32.totalorder %s420_s11, %s416_s10 }
   0x8   : > { %p23_p1 = scmp.eq.s32.totalorder %s22_s17, 0  ;;  %p33_p2 = scmp.eq.s32.totalorder %s424_s12, 0 }
   0x9   : > { %p38_p3 = scmp.ne.s32.totalorder %s416_s10, %s412_s9  ;;  %p39_p4 = scmp.eq.s32.totalorder %s464_s13, 0 }
   0xa   : > { %s480_s18 = scalar_select %p23_p1, %s420_s11, %s25_s16  }
   0xb   : > { %p482_p5 = por %p33_p2, %p32_p0  ;;  %p486_p6 = por %p39_p4, %p38_p3 }
   0xc   : > { %p83_p7 = scmp.eq.s32.totalorder %s464_s13, 1  ;;  %p89_p8 = scmp.eq.s32.totalorder %s267_s14, 1 }
   0xd   : > { %p292_p10 = scmp.lt.s32.totalorder %s424_s12, 2  ;;  %s112_s23 = sand.u32 1, %s420_s11  }
   0xe   : > { %p493_p11 = por %p83_p7, %p32_p0  ;;  %p497_p12 = por %p89_p8, %p38_p3 }
   0xf   : > { %s271_s24 = sshll.u32 %s424_s12, 7  ;;  %s270_s25 = sshll.u32 %s112_s23, 3 }
  0x10   : > { %s616_s21 = scalar_select %p493_p11, 1, 0 }
  0x11   : > { %s617_s22 = scalar_select %p497_p12, 1, 0 }
  0x12   : > { %s506_s28 = scalar_lea.hbm %s610_s0, %s271_s24  ;;  %s116_s29 = scalar_lea.vmem [#allocation2], %s270_s25 }
  0x13   : > { %s123_s30 = sshll.u32 %s116_s29, 4  ;;  %p510_p13 = pnand %p292_p10, %p482_p5  ;;  %s514_s30 = int_to_ptr.vmem [resolvable:$true] %s123_s30 }
  0x14   : > { %s113_s4 = scalar_lea.sflag [#allocation3], %s112_s23  ;;  %s328_s5 = scalar_lea.hbm %s506_s28, 128 }
  0x15   : > { %p329_p2 = scmp.ne.s32.totalorder %s506_s28, %s328_s5  ;;  %p330_p3 = pneg %p510_p13 }
  0x16   : > { %s333_s8 = scalar_lea.hbm %s610_s0, 256  ;;  %p334_p5 = scmp.lt.u32.totalorder %s506_s28, %s610_s0 }
  0x17   : > { %p331_p4 = pnand %p330_p3, %p329_p2  ;;  %p335_p8 = scmp.lt.u32.totalorder %s333_s8, %s328_s5 }
  0x18   : > { %p337_p9 = scmp.lt.u32.totalorder %s328_s5, %s506_s28 }
  0x19   : > { %p332_p7 = pneg %p331_p4  ;;  %p336_p10 = por %p335_p8, %p334_p5 }
  0x1b   : > { %p338_p0 = por %p337_p9, %p336_p10 }
  0x1d   : > { %p339_p1 = pnand %p338_p0, %p332_p7 }
  0x1f   : > { %342 = shalt.err (!%p339_p1)
}
  0x20   : > { %s343_s17 = scalar_lea.vmem %s514_s30, 128  ;;  %s426_s19 = smov [#allocation2]  }
  0x21   : > { %p344_p2 = scmp.ne.s32.totalorder %s514_s30, %s343_s17  ;;  %s348_s23 = sshll.u32 %s426_s19, 4  ;;  %s349_s23 = int_to_ptr.vmem [resolvable:$false] %s348_s23 }
  0x22   : > { %s350_s24 = scalar_lea.vmem %s349_s23, 256  ;;  %p351_p11 = scmp.lt.s32.totalorder %s514_s30, %s349_s23 }
  0x23   : > { %p346_p4 = pnand %p344_p2, %p330_p3  ;;  %p352_p5 = scmp.lt.s32.totalorder %s350_s24, %s343_s17 }
  0x25   : > { %p347_p12 = pneg %p346_p4  ;;  %p353_p8 = por %p352_p5, %p351_p11 }
  0x27   : > { %p354_p9 = pnand %p353_p8, %p347_p12 }
  0x29   : > { %357 = shalt.err (!%p354_p9)
}
  0x2a   : > { %287 = dma.hbm_to_vmem [thread:$0]  (!%p510_p13), %s506_s28, 128, %s514_s30, %s113_s4  }
  0x2b   : > { %p619_p0 = scmp.lt.s32.totalorder %s424_s12, 3  ;;  %p620_p1 = scmp.ge.s32.totalorder %s424_s12, 1 }
  0x2d   : > { %p129_p3 = pnand %p620_p1, %p619_p0 }
  0x2e   : > { %s548_s25 = sand.u32 (!%p129_p3), 1, %s416_s10  }
  0x2f   : > { %132 = sbr.rel (%p129_p3) target bundleno = 381 (0x17d), region = 28  ;;  %s273_s26 = sshll.u32 (!%p129_p3), %s548_s25, 3 }
  0x30   : > { %s135_s27 = scalar_lea.sflag (!%p129_p3), [#allocation3], %s548_s25  ;;  %s138_s29 = scalar_lea.vmem (!%p129_p3), [#allocation2], %s273_s26 }
  0x36   : > { %403 = dma.done.wait (%p486_p6), %s135_s27, 128  }
  0x37   : > { %405 = vsyncadd (%p486_p6), %s135_s27, 4294967168  ;;  %vm160_vm0 = vcmask 261120   ;;  %v159_v0 = vld [vmem:[%s138_s29] sm:$0xff]  ;;  %s277_s30 = sshll.u32 %s464_s13, 7  ;;  %s158_s3 = scalar_lea.vmem [#allocation5], %s273_s26 }
  0x38   : > { %v161_v1 = vsel %vm160_vm0, %v159_v0, 0.0  ;;  %v275_v11 = vld [vmem:[%s611_s1] ss:$0 sm:$0xff]  ;;  %s197_s4 = sshll.u32 %s158_s3, 4  ;;  %s565_s7 = scalar_lea.hbm %s612_s2, %s277_s30  ;;  %s567_s4 = int_to_ptr.vmem [resolvable:$true] %s197_s4 }
  0x39   : > { %162 = vadd.xlane.f32.xlu0 %v161_v1  ;;  %s184_s8 = scalar_lea.sflag [#allocation4], %s548_s25  ;;  %s358_s14 = scalar_lea.vmem %s567_s4, 128 }
  0x3a   : > { %p359_p6 = scmp.ne.s32.totalorder %s567_s4, %s358_s14  ;;  %p621_p11 = scmp.ne.s32.totalorder %s616_s21, 0 }
  0x3b   : > { %s427_s13 = smov [#allocation5]  }
  0x3c   : > { %p360_p12 = pnand %p359_p6, %p621_p11  ;;  %s362_s16 = sshll.u32 %s427_s13, 4  ;;  %s363_s16 = int_to_ptr.vmem [resolvable:$false] %s362_s16 }
  0x3d   : > { %s364_s17 = scalar_lea.vmem %s363_s16, 256  ;;  %p365_p7 = scmp.lt.s32.totalorder %s567_s4, %s363_s16 }
  0x3e   : > { %p361_p13 = pneg %p360_p12  ;;  %p366_p10 = scmp.lt.s32.totalorder %s364_s17, %s358_s14 }
  0x40   : > { %p367_p2 = por %p366_p10, %p365_p7 }
  0x42   : > { %p368_p4 = pnand %p367_p2, %p361_p13 }
  0xc6   : > { %v163_v2 = vpop.xlane.xlu0 %162 }
  0xc7   : > { %v164_v3 = vmul.f32 0.03125, %v163_v2 }
  0xc9   : > { %v165_v4 = vsub.f32 %v159_v0, %v164_v3 }
  0xcb   : > { %v166_v5 = vmul.f32 %v165_v4, %v165_v4 }
  0xcd   : > { %v167_v6 = vsel %vm160_vm0, %v166_v5, 0.0 }
  0xce   : > { %168 = vadd.xlane.f32.xlu0 %v167_v6 }
 0x15b   : > { %v169_v7 = vpop.xlane.xlu0 %168 }
 0x15c   : > { %v170_v8 = vmul.f32 0.03125, %v169_v7 }
 0x15e   : > { %v171_v9 = vadd.f32 1e-05, %v170_v8 }
 0x160   : > { %326 = vrsqrt.f32 %v171_v9 }
 0x16a   : > { %v327_v10 = vpop.eup %326 }
 0x16b   : > { %v173_v12 = vmul.f32 %v327_v10, %v159_v0 }
 0x16d   : > { %v181_v13 = vmul.f32 %v275_v11, %v173_v12 }
 0x16f   : > { %182 = vst.msk [vmem:[%s158_s3] sm:$0xff] %vm160_vm0, %v181_v13 }
 0x170   : > { %371 = shalt.err (!%p368_p4)
}
 0x171   : > { %s372_s19 = scalar_lea.hbm %s565_s7, 128  ;;  %s376_s25 = scalar_lea.hbm %s612_s2, 256 }
 0x172   : > { %p373_p5 = scmp.ne.s32.totalorder %s565_s7, %s372_s19  ;;  %p377_p0 = scmp.lt.u32.totalorder %s565_s7, %s612_s2 }
 0x173   : > { %p378_p1 = scmp.lt.u32.totalorder %s376_s25, %s372_s19  ;;  %p380_p6 = scmp.lt.u32.totalorder %s372_s19, %s565_s7 }
 0x174   : > { %p374_p8 = pnand %p373_p5, %p621_p11 }
 0x175   : > { %p379_p3 = por %p378_p1, %p377_p0 }
 0x176   : > { %p375_p9 = pneg %p374_p8 }
 0x177   : > { %p381_p12 = por %p380_p6, %p379_p3 }
 0x179   : > { %p382_p13 = pnand %p381_p12, %p375_p9 }
 0x17b   : > { %385 = shalt.err (!%p382_p13)
}
 0x17c   : > { %282 = dma.vmem_to_hbm [thread:$0]  (%p621_p11), %s567_s4, 128, %s565_s7, %s184_s8  }
 0x17d PF: > { %s209_s29 = sand.u32 1, %s412_s9   ;;  %p622_p7 = scmp.ne.s32.totalorder %s617_s22, 0 }
 0x17e   : > { %p623_p10 = scmp.ge.s32.totalorder %s424_s12, 2  ;;  %s210_s20 = scalar_lea.sflag [#allocation4], %s209_s29 }
 0x180   : > { %p289_p2 = pnand %p623_p10, %p622_p7 }
 0x182   : > { %407 = dma.done.wait (!%p289_p2), %s210_s20, 128  }
 0x183   : > { %409 = vsyncadd (!%p289_p2), %s210_s20, 4294967168  ;;  %p15_p4 = scmp.ge.s32.totalorder %s468_s15, 4   ;;  %s624_s9 = smov %s416_s10 }
 0x184   : > { %s625_s10 = smov %s420_s11  ;;  %s626_s11 = smov %s480_s18 }
 0x185   : > { %s627_s12 = smov %s468_s15  ;;  %17 = sbr.rel (!%p15_p4) target bundleno = 5 (0x5), region = 73 }
 0x18c   :  { %215 = vsyncpa [#allocation3], 1 }
 0x18d   :  { %217 = vsyncpa [#allocation3 + $0x1], 1 }
 0x18e   :  { %218 = vsyncpa [#allocation4], 1 }
 0x18f   :  { %220 = vsyncpa [#allocation4 + $0x1], 1 }

</bundles_post_ra>
